<compile_context>
chip_gen: v5e
topology: v5e:2x2
jax: 0.10.0
libtpu: 0.0.40
codegen_flags: <defaults>
</compile_context>

<pallas_src>
import math
import functools

import jax
import jax.numpy as jnp
from jax import lax
from jax.experimental import pallas as pl
from jax.experimental.pallas import tpu as pltpu

_MASK = -1e30                      # finite "−inf" for causal masking
_GELU_C = math.sqrt(2.0 / math.pi)
_VMEM_LIMIT = 32 * 1024 * 1024     # explicit scoped-VMEM budget (v7x-safe)


def _layernorm(x, g, b, eps=1e-5):
    """f32 LayerNorm over the last axis (g, b broadcast from (1, C))."""
    mu = jnp.mean(x, axis=-1, keepdims=True)
    xc = x - mu
    var = jnp.mean(xc * xc, axis=-1, keepdims=True)
    return xc * lax.rsqrt(var + eps) * g + b


# --------------------------------------------------------------------------
# Stage 1: ln_1 + fused QKV projection
# --------------------------------------------------------------------------
def _ln_qkv_kernel(x_ref, g_ref, b_ref, w_ref, bias_ref, qkv_ref):
    # x_ref: (1, tq, C) f32; w_ref: (C, 3C) bf16; bias_ref: (1, 3C) f32
    x = x_ref[0]                                        # (tq, C) f32
    xn = _layernorm(x, g_ref[...], b_ref[...])          # f32 elementwise
    qkv = jnp.dot(xn.astype(w_ref.dtype), w_ref[...],
                  preferred_element_type=jnp.float32) + bias_ref[...]
    qkv_ref[0] = qkv.astype(qkv_ref.dtype)              # lane-dense (tq, 3C) store


# --------------------------------------------------------------------------
# Stage 2: flash attention (online softmax) + output projection + residual
# --------------------------------------------------------------------------
def _flash_attn_proj_kernel(q_ref, k_ref, v_ref, xres_ref, wp_ref, bp_ref,
                            o_ref, m_sc, l_sc, acc_sc, *, tq, tk):
    # q_ref: (1, H, tq, D) bf16 ; k_ref/v_ref: (1, H, tk, D) bf16
    # xres_ref: (1, tq, C) f32  ; wp_ref: (C, C) bf16 ; bp_ref: (1, C) f32
    qi = pl.program_id(1)
    ki = pl.program_id(2)

    @pl.when(ki == 0)
    def _init():
        m_sc[...] = jnp.full(m_sc.shape, _MASK, jnp.float32)
        l_sc[...] = jnp.zeros(l_sc.shape, jnp.float32)
        acc_sc[...] = jnp.zeros(acc_sc.shape, jnp.float32)

    q_start = qi * tq
    k_start = ki * tk

    # Skip KV blocks that are entirely above the causal diagonal.
    @pl.when(k_start < q_start + tq)
    def _compute():
        qh = q_ref[0]                                   # (H, tq, D) bf16 (scale pre-folded)
        kh = k_ref[0]                                   # (H, tk, D) bf16
        vh = v_ref[0]                                   # (H, tk, D) bf16
        s = jnp.einsum("hqd,hkd->hqk", qh, kh,
                       preferred_element_type=jnp.float32)   # (H, tq, tk) f32

        def _update(scores):
            m_prev = m_sc[...]
            m_new = jnp.maximum(m_prev, scores.max(axis=-1, keepdims=True))
            alpha = jnp.exp(m_prev - m_new)
            p = jnp.exp(scores - m_new)                 # f32 (EUP)
            l_sc[...] = alpha * l_sc[...] + p.sum(axis=-1, keepdims=True)
            acc_sc[...] = alpha * acc_sc[...] + jnp.einsum(
                "hqk,hkd->hqd", p.astype(vh.dtype), vh,
                preferred_element_type=jnp.float32)
            m_sc[...] = m_new

        fully_visible = (k_start + tk) <= (q_start + 1)  # whole block below diagonal

        @pl.when(fully_visible)
        def _():
            _update(s)                                   # no mask needed

        @pl.when(jnp.logical_not(fully_visible))
        def _():
            row = lax.broadcasted_iota(jnp.int32, (tq, tk), 0) + q_start
            col = lax.broadcasted_iota(jnp.int32, (tq, tk), 1) + k_start
            _update(jnp.where((col <= row)[None, :, :], s, _MASK))

    @pl.when(ki == pl.num_programs(2) - 1)
    def _finalize():
        inv_l = pl.reciprocal(l_sc[...], approx=True)    # EUP, (H, tq, 1)
        att = acc_sc[...] * inv_l                        # (H, tq, D) f32
        h, _, d = att.shape
        att = jnp.swapaxes(att, 0, 1).reshape(tq, h * d)  # (tq, C)
        y = jnp.dot(att.astype(wp_ref.dtype), wp_ref[...],
                    preferred_element_type=jnp.float32) + bp_ref[...]
        o_ref[0] = (xres_ref[0] + y).astype(o_ref.dtype)  # residual, lane-dense store


# --------------------------------------------------------------------------
# Stage 3: ln_2 + MLP (tanh-GELU) + residual
# --------------------------------------------------------------------------
def _ln_mlp_kernel(x_ref, g_ref, b_ref, wfc_ref, bfc_ref, wp_ref, bp_ref, o_ref):
    x = x_ref[0]                                         # (tq, C) f32
    xn = _layernorm(x, g_ref[...], b_ref[...])
    h = jnp.dot(xn.astype(wfc_ref.dtype), wfc_ref[...],
                preferred_element_type=jnp.float32) + bfc_ref[...]   # (tq, 4C) f32
    # myGelu: 0.5*x*(1+tanh(sqrt(2/pi)*(x+0.044715*x^3))) — f32, tanh on EUP
    g = 0.5 * h * (1.0 + jnp.tanh(_GELU_C * (h + 0.044715 * h * h * h)))
    y = jnp.dot(g.astype(wp_ref.dtype), wp_ref[...],
                preferred_element_type=jnp.float32) + bp_ref[...]
    o_ref[0] = (x + y).astype(o_ref.dtype)


# --------------------------------------------------------------------------
# Wrapper
# --------------------------------------------------------------------------
def krlawgpt_block(x, params, *, n_head, q_tile=512, kv_tile=512):
    """x: (B, T, C) f32. params: (g1, b1, wqkv(C,3C), bqkv(3C,), wproj(C,C),
    bproj(C,), g2, b2, wfc(C,4C), bfc(4C,), wp2(4C,C), bp2(C,))."""
    B, T, C = x.shape
    H = n_head
    D = C // H
    tq = min(q_tile, T)
    tk = min(kv_tile, T)
    assert T % tq == 0 and T % tk == 0

    (g1, b1, wqkv, bqkv, wproj, bproj, g2, b2, wfc, bfc, wp2, bp2) = params

    # Fold the 1/sqrt(D) attention scale into the Q columns of c_attn (one-time
    # parameter-side transform -> zero in-kernel cost on the (T,T) scores).
    scale = 1.0 / math.sqrt(D)
    wqkv = wqkv.at[:, :C].multiply(scale)
    bqkv = bqkv.at[:C].multiply(scale)

    # Matmul operands in bf16 (full-rate MXU), biases / LN params stay f32.
    wqkv_b = wqkv.astype(jnp.bfloat16)
    wproj_b = wproj.astype(jnp.bfloat16)
    wfc_b = wfc.astype(jnp.bfloat16)
    wp2_b = wp2.astype(jnp.bfloat16)

    g1_2 = g1.reshape(1, C).astype(jnp.float32)
    b1_2 = b1.reshape(1, C).astype(jnp.float32)
    g2_2 = g2.reshape(1, C).astype(jnp.float32)
    b2_2 = b2.reshape(1, C).astype(jnp.float32)
    bqkv_2 = bqkv.reshape(1, 3 * C).astype(jnp.float32)
    bproj_2 = bproj.reshape(1, C).astype(jnp.float32)
    bfc_2 = bfc.reshape(1, 4 * C).astype(jnp.float32)
    bp2_2 = bp2.reshape(1, C).astype(jnp.float32)

    nq = T // tq
    nk = T // tk

    cp2d = pltpu.CompilerParams(dimension_semantics=("parallel", "parallel"),
                                vmem_limit_bytes=_VMEM_LIMIT)

    # ---- stage 1: ln_1 + QKV projection ----------------------------------
    qkv = pl.pallas_call(
        _ln_qkv_kernel,
        out_shape=jax.ShapeDtypeStruct((B, T, 3 * C), jnp.bfloat16),
        grid=(B, nq),
        in_specs=[
            pl.BlockSpec((1, tq, C), lambda b, t: (b, t, 0)),
            pl.BlockSpec((1, C), lambda b, t: (0, 0)),
            pl.BlockSpec((1, C), lambda b, t: (0, 0)),
            pl.BlockSpec((C, 3 * C), lambda b, t: (0, 0)),
            pl.BlockSpec((1, 3 * C), lambda b, t: (0, 0)),
        ],
        out_specs=pl.BlockSpec((1, tq, 3 * C), lambda b, t: (b, t, 0)),
        compiler_params=cp2d,
    )(x, g1_2, b1_2, wqkv_b, bqkv_2)

    # Layout plumbing in XLA: split heads so the attention kernel consumes
    # head-major (B, H, T, D) blocks with no in-kernel operand transposes.
    qkv5 = qkv.reshape(B, T, 3, H, D)
    q4 = qkv5[:, :, 0].transpose(0, 2, 1, 3)
    k4 = qkv5[:, :, 1].transpose(0, 2, 1, 3)
    v4 = qkv5[:, :, 2].transpose(0, 2, 1, 3)

    # ---- stage 2: flash attention + out projection + residual ------------
    attn_kernel = functools.partial(_flash_attn_proj_kernel, tq=tq, tk=tk)
    h = pl.pallas_call(
        attn_kernel,
        out_shape=jax.ShapeDtypeStruct((B, T, C), x.dtype),
        grid=(B, nq, nk),
        in_specs=[
            pl.BlockSpec((1, H, tq, D), lambda b, i, j: (b, 0, i, 0)),
            pl.BlockSpec((1, H, tk, D), lambda b, i, j: (b, 0, j, 0)),
            pl.BlockSpec((1, H, tk, D), lambda b, i, j: (b, 0, j, 0)),
            pl.BlockSpec((1, tq, C), lambda b, i, j: (b, i, 0)),
            pl.BlockSpec((C, C), lambda b, i, j: (0, 0)),
            pl.BlockSpec((1, C), lambda b, i, j: (0, 0)),
        ],
        out_specs=pl.BlockSpec((1, tq, C), lambda b, i, j: (b, i, 0)),
        scratch_shapes=[
            pltpu.VMEM((H, tq, 1), jnp.float32),   # m (running max)
            pltpu.VMEM((H, tq, 1), jnp.float32),   # l (running denom)
            pltpu.VMEM((H, tq, D), jnp.float32),   # acc (unnormalized out)
        ],
        compiler_params=pltpu.CompilerParams(
            dimension_semantics=("parallel", "parallel", "arbitrary"),
            vmem_limit_bytes=_VMEM_LIMIT),
    )(q4, k4, v4, x, wproj_b, bproj_2)

    # ---- stage 3: ln_2 + MLP + residual -----------------------------------
    out = pl.pallas_call(
        _ln_mlp_kernel,
        out_shape=jax.ShapeDtypeStruct((B, T, C), x.dtype),
        grid=(B, nq),
        in_specs=[
            pl.BlockSpec((1, tq, C), lambda b, t: (b, t, 0)),
            pl.BlockSpec((1, C), lambda b, t: (0, 0)),
            pl.BlockSpec((1, C), lambda b, t: (0, 0)),
            pl.BlockSpec((C, 4 * C), lambda b, t: (0, 0)),
            pl.BlockSpec((1, 4 * C), lambda b, t: (0, 0)),
            pl.BlockSpec((4 * C, C), lambda b, t: (0, 0)),
            pl.BlockSpec((1, C), lambda b, t: (0, 0)),
        ],
        out_specs=pl.BlockSpec((1, tq, C), lambda b, t: (b, t, 0)),
        compiler_params=cp2d,
    )(h, g2_2, b2_2, wfc_b, bfc_2, wp2_b, bp2_2)

    return out


# --------------------------------------------------------------------------
# Pure-JAX f32 reference mirroring the PyTorch Block forward (dropout=0)
# --------------------------------------------------------------------------
def _reference(x, params, n_head):
    (g1, b1, wqkv, bqkv, wproj, bproj, g2, b2, wfc, bfc, wp2, bp2) = params

    def ln(v, g, b):
        mu = v.mean(-1, keepdims=True)
        var = ((v - mu) ** 2).mean(-1, keepdims=True)
        return (v - mu) / jnp.sqrt(var + 1e-5) * g + b

    B, T, C = x.shape
    D = C // n_head
    h = ln(x, g1, b1)
    qkv = h @ wqkv + bqkv
    q, k, v = jnp.split(qkv, 3, axis=-1)
    q = q.reshape(B, T, n_head, D).transpose(0, 2, 1, 3)
    k = k.reshape(B, T, n_head, D).transpose(0, 2, 1, 3)
    v = v.reshape(B, T, n_head, D).transpose(0, 2, 1, 3)
    s = jnp.einsum("bhqd,bhkd->bhqk", q, k) / math.sqrt(D)
    mask = jnp.tril(jnp.ones((T, T), dtype=bool))
    s = jnp.where(mask[None, None], s, -jnp.inf)
    p = jax.nn.softmax(s, axis=-1)
    att = jnp.einsum("bhqk,bhkd->bhqd", p, v)
    att = att.transpose(0, 2, 1, 3).reshape(B, T, C)
    x = x + att @ wproj + bproj
    h2 = ln(x, g2, b2)
    u = h2 @ wfc + bfc
    g = 0.5 * u * (1.0 + jnp.tanh(_GELU_C * (u + 0.044715 * u ** 3)))
    return x + g @ wp2 + bp2


if __name__ == "__main__":
    # Small config: B=2, block_size T=8, n_embd=32, n_head=4, bias=True, dropout=0.0
    B, T, C, H = 2, 8, 32, 4

    key = jax.random.PRNGKey(0)
    ks = jax.random.split(key, 13)

    x = jax.random.normal(ks[0], (B, T, C), jnp.float32)
    g1 = 1.0 + 0.1 * jax.random.normal(ks[1], (C,), jnp.float32)
    b1 = 0.1 * jax.random.normal(ks[2], (C,), jnp.float32)
    wqkv = 0.02 * jax.random.normal(ks[3], (C, 3 * C), jnp.float32)
    bqkv = 0.02 * jax.random.normal(ks[4], (3 * C,), jnp.float32)
    wproj = 0.02 * jax.random.normal(ks[5], (C, C), jnp.float32)
    bproj = 0.02 * jax.random.normal(ks[6], (C,), jnp.float32)
    g2 = 1.0 + 0.1 * jax.random.normal(ks[7], (C,), jnp.float32)
    b2 = 0.1 * jax.random.normal(ks[8], (C,), jnp.float32)
    wfc = 0.02 * jax.random.normal(ks[9], (C, 4 * C), jnp.float32)
    bfc = 0.02 * jax.random.normal(ks[10], (4 * C,), jnp.float32)
    wp2 = 0.02 * jax.random.normal(ks[11], (4 * C, C), jnp.float32)
    bp2 = 0.02 * jax.random.normal(ks[12], (C,), jnp.float32)

    params = (g1, b1, wqkv, bqkv, wproj, bproj, g2, b2, wfc, bfc, wp2, bp2)

    out = krlawgpt_block(x, params, n_head=H)
    out = jax.block_until_ready(out)

    ref = _reference(x, params, H)
    assert out.shape == (B, T, C)
    max_err = float(jnp.max(jnp.abs(out - ref)))
    # bf16 matmul operands + approx reciprocal -> loosened tolerance vs f32 ref
    assert jnp.allclose(out, ref, atol=2e-2, rtol=2e-2), f"mismatch vs reference (max_err={max_err})"

    print("KERNEL_OK")
</pallas_src>

<mosaic_0001>
module attributes {stable_mosaic.version = 11 : i64} {
  func.func @_ln_qkv_kernel(%arg0: i32, %arg1: i32, %arg2: memref<1x8x32xf32, #tpu.memory_space<vmem>>, %arg3: memref<1x32xf32, #tpu.memory_space<vmem>>, %arg4: memref<1x32xf32, #tpu.memory_space<vmem>>, %arg5: memref<32x96xbf16, #tpu.memory_space<vmem>>, %arg6: memref<1x96xf32, #tpu.memory_space<vmem>>, %arg7: memref<1x8x96xbf16, #tpu.memory_space<vmem>>) attributes {dimension_semantics = [#tpu.dimension_semantics<parallel>, #tpu.dimension_semantics<parallel>], iteration_bounds = array<i64: 2, 1>, scalar_prefetch = 0 : i64, scratch_operands = 0 : i64, tpu.core_type = #tpu.core_type<tc>, window_params = [{transform_indices = @transform_0, window_bounds = array<i64: 1, 8, 32>}, {pipeline_mode = #tpu.pipeline_mode<synchronous>, transform_indices = @transform_1, window_bounds = array<i64: 1, 32>}, {pipeline_mode = #tpu.pipeline_mode<synchronous>, transform_indices = @transform_2, window_bounds = array<i64: 1, 32>}, {pipeline_mode = #tpu.pipeline_mode<synchronous>, transform_indices = @transform_3, window_bounds = array<i64: 32, 96>}, {pipeline_mode = #tpu.pipeline_mode<synchronous>, transform_indices = @transform_4, window_bounds = array<i64: 1, 96>}, {transform_indices = @transform_5, window_bounds = array<i64: 1, 8, 96>}]} {
    %c0 = arith.constant 0 : index
    %c0_0 = arith.constant 0 : index
    %c0_1 = arith.constant 0 : index
    %0 = vector.load %arg2[%c0, %c0_0, %c0_1] : memref<1x8x32xf32, #tpu.memory_space<vmem>>, vector<1x8x32xf32>
    %1 = vector.shape_cast %0 : vector<1x8x32xf32> to vector<8x32xf32>
    %c0_2 = arith.constant 0 : index
    %c0_3 = arith.constant 0 : index
    %2 = vector.load %arg3[%c0_2, %c0_3] : memref<1x32xf32, #tpu.memory_space<vmem>>, vector<1x32xf32>
    %c0_4 = arith.constant 0 : index
    %c0_5 = arith.constant 0 : index
    %3 = vector.load %arg4[%c0_4, %c0_5] : memref<1x32xf32, #tpu.memory_space<vmem>>, vector<1x32xf32>
    %cst = arith.constant dense<0.000000e+00> : vector<8xf32>
    %4 = vector.multi_reduction <add>, %1, %cst [1] : vector<8x32xf32> to vector<8xf32>
    %5 = vector.shape_cast %4 : vector<8xf32> to vector<8x1xf32>
    %cst_6 = arith.constant 3.200000e+01 : f32
    %6 = vector.broadcast %cst_6 : f32 to vector<8x1xf32>
    %7 = arith.divf %5, %6 : vector<8x1xf32>
    %8 = vector.broadcast %7 : vector<8x1xf32> to vector<8x32xf32>
    %9 = arith.subf %1, %8 : vector<8x32xf32>
    %10 = arith.mulf %9, %9 : vector<8x32xf32>
    %cst_7 = arith.constant dense<0.000000e+00> : vector<8xf32>
    %11 = vector.multi_reduction <add>, %10, %cst_7 [1] : vector<8x32xf32> to vector<8xf32>
    %12 = vector.shape_cast %11 : vector<8xf32> to vector<8x1xf32>
    %cst_8 = arith.constant 3.200000e+01 : f32
    %13 = vector.broadcast %cst_8 : f32 to vector<8x1xf32>
    %14 = arith.divf %12, %13 : vector<8x1xf32>
    %cst_9 = arith.constant 9.99999974E-6 : f32
    %15 = vector.broadcast %cst_9 : f32 to vector<8x1xf32>
    %16 = arith.addf %14, %15 : vector<8x1xf32>
    %17 = math.rsqrt %16 : vector<8x1xf32>
    %18 = vector.broadcast %17 : vector<8x1xf32> to vector<8x32xf32>
    %19 = arith.mulf %9, %18 : vector<8x32xf32>
    %20 = vector.broadcast %2 : vector<1x32xf32> to vector<8x32xf32>
    %21 = arith.mulf %19, %20 : vector<8x32xf32>
    %22 = vector.broadcast %3 : vector<1x32xf32> to vector<8x32xf32>
    %23 = arith.addf %21, %22 : vector<8x32xf32>
    %24 = arith.truncf %23 : vector<8x32xf32> to vector<8x32xbf16>
    %c0_10 = arith.constant 0 : index
    %c0_11 = arith.constant 0 : index
    %25 = vector.load %arg5[%c0_10, %c0_11] : memref<32x96xbf16, #tpu.memory_space<vmem>>, vector<32x96xbf16>
    %cst_12 = arith.constant dense<0.000000e+00> : vector<8x96xf32>
    %26 = tpu.matmul %24, %25, %cst_12 {dimension_numbers = #tpu.dot_dimension_numbers<[1], [0], [0], [1], [0, 0, 1, 1], [], []>} : vector<8x32xbf16>, vector<32x96xbf16>, vector<8x96xf32> -> vector<8x96xf32>
    %c0_13 = arith.constant 0 : index
    %c0_14 = arith.constant 0 : index
    %27 = vector.load %arg6[%c0_13, %c0_14] : memref<1x96xf32, #tpu.memory_space<vmem>>, vector<1x96xf32>
    %28 = vector.broadcast %27 : vector<1x96xf32> to vector<8x96xf32>
    %29 = arith.addf %26, %28 : vector<8x96xf32>
    %30 = arith.truncf %29 : vector<8x96xf32> to vector<8x96xbf16>
    %c0_15 = arith.constant 0 : index
    %c0_16 = arith.constant 0 : index
    %c0_17 = arith.constant 0 : index
    %31 = vector.load %arg7[%c0_15, %c0_16, %c0_17] : memref<1x8x96xbf16, #tpu.memory_space<vmem>>, vector<1x8x96xbf16>
    %32 = vector.shape_cast %31 : vector<1x8x96xbf16> to vector<8x96xbf16>
    %33 = vector.shape_cast %30 : vector<8x96xbf16> to vector<1x8x96xbf16>
    tpu.vector_store %arg7[%c0_15, %c0_16, %c0_17], %33 {strides = array<i32>} : memref<1x8x96xbf16, #tpu.memory_space<vmem>>, vector<1x8x96xbf16>,
    return
  }
  func.func @transform_0(%arg0: i32, %arg1: i32) -> (i32, i32, i32) {
    %c0_i32 = arith.constant 0 : i32
    %c0_i32_0 = arith.constant 0 : i32
    return %arg0, %arg1, %c0_i32 : i32, i32, i32
  }
  func.func @transform_1(%arg0: i32, %arg1: i32) -> (i32, i32) {
    %c0_i32 = arith.constant 0 : i32
    %c0_i32_0 = arith.constant 0 : i32
    %c0_i32_1 = arith.constant 0 : i32
    return %c0_i32, %c0_i32_0 : i32, i32
  }
  func.func @transform_2(%arg0: i32, %arg1: i32) -> (i32, i32) {
    %c0_i32 = arith.constant 0 : i32
    %c0_i32_0 = arith.constant 0 : i32
    %c0_i32_1 = arith.constant 0 : i32
    return %c0_i32, %c0_i32_0 : i32, i32
  }
  func.func @transform_3(%arg0: i32, %arg1: i32) -> (i32, i32) {
    %c0_i32 = arith.constant 0 : i32
    %c0_i32_0 = arith.constant 0 : i32
    %c0_i32_1 = arith.constant 0 : i32
    return %c0_i32, %c0_i32_0 : i32, i32
  }
  func.func @transform_4(%arg0: i32, %arg1: i32) -> (i32, i32) {
    %c0_i32 = arith.constant 0 : i32
    %c0_i32_0 = arith.constant 0 : i32
    %c0_i32_1 = arith.constant 0 : i32
    return %c0_i32, %c0_i32_0 : i32, i32
  }
  func.func @transform_5(%arg0: i32, %arg1: i32) -> (i32, i32, i32) {
    %c0_i32 = arith.constant 0 : i32
    %c0_i32_0 = arith.constant 0 : i32
    return %arg0, %arg1, %c0_i32 : i32, i32, i32
  }
}

</mosaic_0001>

<bundles_post_ra>
// kernel: tpu_custom_call.1
= control target key start
LH: loop header
LB: loop body
LE: loop exit
PB: predicated region body
PF: predicated region fallthrough
CT: control target
= control target key end

     0   :  { %10 = vsyncpa [#allocation3], 0  ;;  %s978_s0 = inlined_call_operand.hbm [shape: f32[2,8,32], index: 0, kind: input, shape index: {}]   ;;  %s979_s1 = inlined_call_operand.hbm [shape: f32[1,32], index: 1, kind: input, shape index: {}]   ;;  %s980_s2 = inlined_call_operand.vmem [shape: f32[1,32], index: 2, kind: input, shape index: {}]   ;;  %s981_s3 = inlined_call_operand.hbm [shape: bf16[32,96], index: 3, kind: input, shape index: {}]   ;;  %s982_s4 = inlined_call_operand.vmem [shape: f32[1,96], index: 4, kind: input, shape index: {}]   ;;  %s983_s5 = inlined_call_operand.hbm [shape: bf16[2,8,96], index: 5, kind: output, shape index: {}]  }
   0x1   :  { %12 = vsyncpa [#allocation3 + $0x1], 0 }
   0x2   :  { %13 = vsyncpa [#allocation6], 0 }
   0x3   :  { %14 = vsyncpa [#allocation4], 0 }
   0x4   :  { %16 = vsyncpa [#allocation4 + $0x1], 0  ;;  %s822_s18 = smov 0   ;;  %s824_s19 = smov 0  }
   0x5   :  { %s826_s20 = smov 0   ;;  %s828_s21 = smov 0  }
   0x6   :  { %s830_s22 = smov 0   ;;  %s832_s23 = smov 0  }
   0x7 LB: > { %s488_s24 = sadd.s32 4294967295, %s785_s23   ;;  %s489_s25 = sadd.s32 4294967294, %s785_s23   ;;  %s785_s23 = sphi %s832_s23, %s22_s23   ;;  %s781_s22 = sphi %s830_s22, %s993_s22   ;;  %s777_s21 = sphi %s828_s21, %s992_s21   ;;  %s773_s20 = sphi %s826_s20, %s991_s20   ;;  %s769_s19 = sphi %s824_s19, %s990_s19   ;;  %s765_s18 = sphi %s822_s18, %s989_s18  }
   0x8   : > { %p56_p0 = scmp.ne.s32.totalorder %s769_s19, %s765_s18  ;;  %p858_p1 = scmp.eq.s32.totalorder %s488_s24, 0 }
   0x9   : > { %p172_p2 = scmp.eq.s32.totalorder %s489_s25, 1  ;;  %p490_p4 = scmp.ge.s32.totalorder %s785_s23, 1 }
   0xa   : > { %p864_p3 = por %p858_p1, %p56_p0  ;;  %p179_p6 = scmp.lt.s32.totalorder %s785_s23, 3 }
   0xb   : > { %p869_p5 = por %p172_p2, %p56_p0  ;;  %s191_s6 = sshll.u32 %s979_s1, 4  ;;  %s192_s6 = int_to_ptr.hbm [resolvable:$true] %s191_s6 }
   0xc   : > { %p877_p7 = pnand %p490_p4, %p179_p6  ;;  %p493_p8 = scmp.ge.s32.totalorder %s785_s23, 2 }
   0xd   : > { %s787_s8 = smov [#allocation5]   ;;  %s205_s12 = sshll.u32 %s981_s3, 4  ;;  %s206_s12 = int_to_ptr.hbm [resolvable:$true] %s205_s12 }
   0xe   : > { %p528_p9 = pneg %p877_p7  ;;  %s193_s9 = sshll.u32 %s787_s8, 4  ;;  %s194_s9 = int_to_ptr.vmem [resolvable:$true] %s193_s9 }
   0xf   : > { %s788_s13 = smov [#allocation7]   ;;  %s789_s15 = smov 64  }
  0x10   : > { %p529_p10 = pnand %p528_p9, %p858_p1  ;;  %s207_s14 = sshll.u32 %s788_s13, 4  ;;  %s208_s14 = int_to_ptr.vmem [resolvable:$true] %s207_s14 }
  0x11   : > { %s790_s16 = smov 4   ;;  %p166_p11 = scmp.eq.s32.totalorder %s488_s24, 1 }
  0x12   : > { %531 = dma.hbm_to_vmem [thread:$0]  (!%p529_p10), %s192_s6, 16, %s194_s9, [#allocation6]  }
  0x13   : > { %534 = dma.hbm_to_vmem [thread:$0]  (!%p529_p10), %s206_s12, 256, %s208_s14, [#allocation6], %s789_s15, %s789_s15, %s790_s16  }
  0x14   : > { %s34_s17 = sadd.s32 1, %s781_s22  ;;  %s43_s25 = sadd.s32 1, %s773_s20 }
  0x15   : > { %p36_p12 = scmp.ge.s32.totalorder %s34_s17, 2  ;;  %p50_p13 = scmp.ne.s32.totalorder %s773_s20, %s769_s19 }
  0x16   : > { %p51_p0 = scmp.eq.s32.totalorder %s785_s23, 0  ;;  %p545_p4 = scmp.lt.s32.totalorder %s785_s23, 2 }
  0x17   : > { %s995_s17 = smov (%p36_p12, %s34_s17), 0  ;;  %p898_p2 = por %p166_p11, %p50_p13 }
  0x18   : > { %s38_s30 = ssub.s32 %s781_s22, %s995_s17  ;;  %s224_s6 = sand.u32 1, %s773_s20  }
  0x19   : > { %p41_p6 = scmp.eq.s32.totalorder %s38_s30, 0  ;;  %p52_p9 = por %p51_p0, %p50_p13 }
  0x1a   : > { %s494_s8 = sshll.u32 %s224_s6, 3  ;;  %s495_s24 = sshll.u32 %s781_s22, 3 }
  0x1b   : > { %s908_s9 = scalar_select %p41_p6, %s773_s20, %s43_s25  }
  0x1c   : > { %s233_s12 = scalar_lea.hbm %s978_s0, %s495_s24  ;;  %s228_s14 = scalar_lea.vmem [#allocation2], %s494_s8 }
  0x1d   : > { %s235_s13 = sshll.u32 %s233_s12, 4  ;;  %s237_s15 = sshll.u32 %s228_s14, 4  ;;  %s236_s13 = int_to_ptr.hbm [resolvable:$true] %s235_s13  ;;  %s238_s15 = int_to_ptr.vmem [resolvable:$true] %s237_s15 }
  0x1e   : > { %p536_p10 = pnand %p545_p4, %p52_p9  ;;  %s225_s16 = scalar_lea.sflag [#allocation3], %s224_s6 }
  0x1f   : > { %246 = sbr.rel (%p877_p7) target bundleno = 444 (0x1bc), region = 40  ;;  %s918_s25 = sand.u32 (!%p877_p7), 1, %s769_s19  }
  0x20   : > { %538 = dma.hbm_to_vmem [thread:$0]  (!%p536_p10), %s236_s13, 128, %s238_s15, %s225_s16  }
  0x21   : > { %s497_s30 = sshll.u32 (!%p877_p7), %s918_s25, 3  ;;  %s249_s24 = scalar_lea.sflag (!%p877_p7), [#allocation3], %s918_s25 }
  0x22   : > { %s252_s10 = scalar_lea.vmem (!%p877_p7), [#allocation2], %s497_s30 }
  0x24   : > { %752 = dma.done.wait (%p864_p3), %s249_s24, 128  }
  0x25   : > { %754 = vsyncadd (%p864_p3), %s249_s24, 4294967168 }
  0x26   : > { %756 = dma.done.wait (%p858_p1), [#allocation6], 272  }
  0x27   : > { %758 = vsyncadd (%p858_p1), [#allocation6], 4294967024  ;;  %vm294_vm0 = vcmask 261120   ;;  %v291_v0 = vld [vmem:[%s252_s10] sm:$0xff]  ;;  %v791_v2 = vmov 32.0   ;;  %v514_v15 = vld [vmem:[#allocation7] sm:$0xff] }
  0x28   : > { %v295_v1 = vsel %vm294_vm0, %v291_v0, 0.0  ;;  %605 = vrcp.f32 %v791_v2  ;;  %v515_v14 = vld [vmem:[#allocation7 + $0x8] sm:$0xff]  ;;  %v602_v25 = vld [vmem:[#allocation5] ss:$0 sm:$0xff]  ;;  %s500_s7 = sshll.u32 %s918_s25, 2  ;;  %s511_s6 = sshll.u32 %s777_s21, 2 }
  0x29   : > { %296 = vadd.xlane.f32.xlu0 %v295_v1  ;;  %362 = vmatpush.bf16.msra.mxu0 %v515_v14  ;;  %v603_v28 = vld [vmem:[%s980_s2] ss:$0 sm:$0xff]  ;;  %s384_s14 = scalar_lea.hbm %s983_s5, %s511_s6  ;;  %s289_s15 = scalar_lea.vmem [#allocation8], %s500_s7  ;;  %vm370_vm5 = vcmask 781312  }
  0x2a   : > { %v604_v32 = vld [vmem:[%s982_s4] ss:$0 sm:$0xff]  ;;  %s386_s16 = sshll.u32 %s289_s15, 4  ;;  %s388_s30 = sshll.u32 %s384_s14, 4  ;;  %s387_s16 = int_to_ptr.vmem [resolvable:$true] %s386_s16  ;;  %s389_s30 = int_to_ptr.hbm [resolvable:$true] %s388_s30 }
  0x2b   : > { %s373_s21 = scalar_lea.sflag [#allocation4], %s918_s25  ;;  %s713_s24 = sshra.s32 %s389_s30, 4  ;;  %s714_s24 = int_to_ptr.hbm [resolvable:$true] %s713_s24 }
  0x2c   : > { %s715_s10 = scalar_lea.hbm %s714_s24, 4  ;;  %s719_s7 = scalar_lea.hbm %s983_s5, 8 }
  0x2d   : > { %363 = vmatpush.bf16.msra.mxu0 %v514_v15  ;;  %p716_p1 = scmp.ne.s32.totalorder %s714_s24, %s715_s10  ;;  %p720_p11 = scmp.lt.s32.totalorder %s714_s24, %s983_s5 }
  0x2e   : > { %v606_v3 = vpop.eup %605  ;;  %p721_p12 = scmp.lt.s32.totalorder %s719_s7, %s715_s10 }
  0x2f   : > { %v299_v4 = vmul.f32 32.0, %v606_v3  ;;  %vm303_vm1 = vweird.f32 %v606_v3  ;;  %p717_p3 = pnand %p716_p1, %p898_p2 }
  0x30   : > { %p722_p13 = por %p721_p12, %p720_p11 }
  0x31   : > { %v300_v5 = vsub.f32 1.0, %v299_v4  ;;  %p718_p7 = pneg %p717_p3 }
  0x33   : > { %v301_v6 = vmul.f32 %v606_v3, %v300_v5  ;;  %p723_p0 = pnand %p722_p13, %p718_p7 }
  0x35   : > { %v302_v7 = vadd.f32 %v606_v3, %v301_v6 }
  0x37   : > { %v304_v8 = vsel %vm303_vm1, %v606_v3, %v302_v7 }
  0x9c   : > { %v297_v9 = vpop.xlane.xlu0 %296 }
  0x9d   : > { %v305_v10 = vmul.f32 %v304_v8, %v297_v9 }
  0x9f   : > { %v306_v11 = vsub.f32 %v291_v0, %v305_v10 }
  0xa1   : > { %v307_v12 = vmul.f32 %v306_v11, %v306_v11 }
  0xa3   : > { %v308_v13 = vsel %vm294_vm0, %v307_v12, 0.0 }
  0xa4   : > { %309 = vadd.xlane.f32.xlu0 %v308_v13 }
 0x117   : > { %v310_v16 = vpop.xlane.xlu0 %309 }
 0x118   : > { %v311_v17 = vmul.f32 %v310_v16, %v304_v8 }
 0x11a   : > { %v312_v18 = vadd.f32 1e-05, %v311_v17 }
 0x11c   : > { %607 = vrsqrt.f32 %v312_v18  ;;  %vm319_vm3 = vweird.f32 %v312_v18 }
 0x122   : > { %v608_v19 = vpop.eup %607 }
 0x123   : > { %v314_v20 = vmul.f32 %v608_v19, %v312_v18  ;;  %vm320_vm2 = vweird.f32 %v608_v19 }
 0x124   : > { %vm321_vm4 = vmor %vm319_vm3, %vm320_vm2 }
 0x125   : > { %v315_v21 = vmul.f32 %v608_v19, %v314_v20 }
 0x127   : > { %v316_v22 = vmul.f32 0.5, %v315_v21 }
 0x129   : > { %v317_v23 = vsub.f32 1.5, %v316_v22 }
 0x12b   : > { %v318_v24 = vmul.f32 %v608_v19, %v317_v23 }
 0x12d   : > { %v322_v26 = vsel %vm321_vm4, %v608_v19, %v318_v24 }
 0x12e   : > { %v323_v27 = vmul.f32 %v322_v26, %v306_v11 }
 0x130   : > { %v327_v29 = vmul.f32 %v602_v25, %v323_v27 }
 0x132   : > { %v331_v30 = vadd.f32 %v603_v28, %v327_v29 }
 0x134   : > { %v332_v31 = vpack.c.bf16 %v331_v30, %v331_v30 }
 0x136   : > { %509 = vmatmul.msk.bf16.vlgmr.msra.gmra.mxu0 %vm294_vm0, %v332_v31 }
 0x1b3   : > { %v365_v33 = vpop.f32.mrf.mxu0 }
 0x1b4   : > { %v366_v34 = vadd.f32 %v604_v32, %v365_v33 }
 0x1b6   : > { %v369_v35 = vpack.c.bf16 %v366_v34, %v366_v34 }
 0x1b8   : > { %371 = vst.msk [vmem:[%s289_s15] sm:$0xf] %vm370_vm5, %v369_v35 }
 0x1b9   : > { %726 = shalt.err (!%p723_p0)
}
 0x1ba   : > { %526 = dma.vmem_to_hbm [thread:$0]  (%p898_p2), %s387_s16, 64, %s389_s30, %s373_s21  }
 0x1bb   : > { %v367_v36 = vpop.f32.mrf.mxu0 }
 0x1bc PF: > { %s400_s25 = sand.u32 1, %s765_s18   ;;  %p540_p4 = pnand %p493_p8, %p869_p5 }
 0x1bd   : > { %s401_s11 = scalar_lea.sflag [#allocation4], %s400_s25 }
 0x1be   : > { %p541_p6 = pneg %p540_p4 }
 0x1c0   : > { %760 = dma.done.wait (%p541_p6), %s401_s11, 64  }
 0x1c1   : > { %762 = vsyncadd (%p541_p6), %s401_s11, 4294967232  ;;  %s22_s23 = sadd.s32 1, %s785_s23   ;;  %s989_s18 = smov %s769_s19 }
 0x1c2   : > { %p19_p9 = scmp.ge.s32.totalorder %s22_s23, 4   ;;  %s990_s19 = smov %s773_s20 }
 0x1c3   : > { %s991_s20 = smov %s908_s9  ;;  %s992_s21 = smov %s781_s22 }
 0x1c4   : > { %s993_s22 = smov %s995_s17  ;;  %21 = sbr.rel (!%p19_p9) target bundleno = 7 (0x7), region = 93 }
 0x1c9   :  { %407 = vsyncpa [#allocation3], 1 }
 0x1ca   :  { %409 = vsyncpa [#allocation3 + $0x1], 1 }
 0x1cb   :  { %410 = vsyncpa [#allocation6], 1 }
 0x1cc   :  { %411 = vsyncpa [#allocation4], 1 }
 0x1cd   :  { %413 = vsyncpa [#allocation4 + $0x1], 1 }

</bundles_post_ra>
